<compile_context>
chip_gen: v5e
topology: v5e:2x2
jax: 0.10.0
libtpu: 0.0.40
codegen_flags: <defaults>
</compile_context>

<pallas_src>
import math

import jax
import jax.numpy as jnp
from jax.experimental import pallas as pl
from jax.experimental.pallas import tpu as pltpu


def _round_up(x, m):
    return ((x + m - 1) // m) * m


def _cdiv(a, b):
    return -(-a // b)


def _actor_kernel(scale_ref,
                  x_ref, w1_ref, b1_ref, w2_ref, b2_ref, w3_ref, b3_ref,
                  o_ref):
    # In-kernel bf16 cast of the state (rides a free VPU slot; kernel is
    # MXU/DMA bound).  Accumulation is f32 on the MXU.
    x = x_ref[...].astype(jnp.bfloat16)

    h = jnp.dot(x, w1_ref[...], preferred_element_type=jnp.float32) + b1_ref[...]
    h = jnp.maximum(h, 0.0)

    h = jnp.dot(h.astype(jnp.bfloat16), w2_ref[...],
                preferred_element_type=jnp.float32) + b2_ref[...]
    h = jnp.maximum(h, 0.0)

    y = jnp.dot(h.astype(jnp.bfloat16), w3_ref[...],
                preferred_element_type=jnp.float32) + b3_ref[...]

    scale = scale_ref[0, 0]
    o_ref[...] = (jnp.tanh(y) * scale).astype(o_ref.dtype)


def _choose_batch_tile(B, block_b=256):
    """Balanced batch tiles: multiple of 16, target size block_b, and >=2 grid
    steps when the batch is big enough (v7x has 2 TensorCores)."""
    n_tiles = max(1, _cdiv(B, block_b))
    if n_tiles < 2 and B > 32:          # split for megacore when worthwhile
        n_tiles = 2
    tb = _round_up(_cdiv(B, n_tiles), 16)
    b_pad = _round_up(B, tb)
    return tb, b_pad


def prepare_params(params):
    """One-time conversion: weights -> bf16 MXU operands; biases stay f32."""
    return {
        "w1": params["w1"].astype(jnp.bfloat16),
        "b1": params["b1"].astype(jnp.float32),
        "w2": params["w2"].astype(jnp.bfloat16),
        "b2": params["b2"].astype(jnp.float32),
        "w3": params["w3"].astype(jnp.bfloat16),
        "b3": params["b3"].astype(jnp.float32),
    }


def deterministic_actor_forward(state, prepared, action_scale=1.0, block_b=256):
    """state: (B, input_size) f32 -> action: (B, output_size) f32.

    `prepared` must come from prepare_params() (bf16 weights, f32 biases)."""
    B, in_size = state.shape
    hidden = prepared["w1"].shape[1]
    out_size = prepared["w3"].shape[1]

    tb, b_pad = _choose_batch_tile(B, block_b)
    grid = (b_pad // tb,)

    # Only pad the batch (f32, zero rows) when B is not a tile multiple.
    x = state if b_pad == B else jnp.pad(state, ((0, b_pad - B), (0, 0)))

    # Runtime scalar (SMEM) -> no recompile when the scale changes.
    scale = jnp.asarray(action_scale, dtype=jnp.float32).reshape(1, 1)

    flops = 2 * b_pad * (in_size * hidden + hidden * hidden + hidden * out_size)
    bytes_accessed = (4 * b_pad * in_size                                        # state (f32)
                      + 2 * (in_size * hidden + hidden * hidden + hidden * out_size)  # weights (bf16)
                      + 4 * (2 * hidden + out_size)                              # biases (f32)
                      + 4 * b_pad * out_size)                                    # output (f32)

    out = pl.pallas_call(
        _actor_kernel,
        out_shape=jax.ShapeDtypeStruct((b_pad, out_size), jnp.float32),
        grid_spec=pltpu.PrefetchScalarGridSpec(
            num_scalar_prefetch=0,
            grid=grid,
            in_specs=[
                pl.BlockSpec(memory_space=pltpu.MemorySpace.SMEM),     # action_scale (1,1)
                pl.BlockSpec((tb, in_size), lambda i: (i, 0)),         # state tile (pipelined)
                pl.BlockSpec((in_size, hidden), lambda i: (0, 0)),     # w1 (resident)
                pl.BlockSpec((1, hidden), lambda i: (0, 0)),           # b1
                pl.BlockSpec((hidden, hidden), lambda i: (0, 0)),      # w2
                pl.BlockSpec((1, hidden), lambda i: (0, 0)),           # b2
                pl.BlockSpec((hidden, out_size), lambda i: (0, 0)),    # w3 (no lane padding)
                pl.BlockSpec((1, out_size), lambda i: (0, 0)),         # b3
            ],
            out_specs=pl.BlockSpec((tb, out_size), lambda i: (i, 0)),  # unpadded output
        ),
        compiler_params=pltpu.CompilerParams(
            dimension_semantics=("parallel",),
            vmem_limit_bytes=32 * 1024 * 1024,
        ),
        cost_estimate=pl.CostEstimate(
            flops=flops,
            transcendentals=b_pad * out_size,
            bytes_accessed=bytes_accessed,
        ),
    )(scale, x,
      prepared["w1"], prepared["b1"],
      prepared["w2"], prepared["b2"],
      prepared["w3"], prepared["b3"])

    return out[:B]


def init_params(key, input_size, output_size, hidden_size=128):
    """xavier_normal weights stored as (in, out); bias = 0.1 (matches xavier_weights_init_)."""
    def xavier(k, fan_in, fan_out):
        std = math.sqrt(2.0 / (fan_in + fan_out))
        return std * jax.random.normal(k, (fan_in, fan_out), dtype=jnp.float32)

    k1, k2, k3 = jax.random.split(key, 3)
    return {
        "w1": xavier(k1, input_size, hidden_size),
        "b1": jnp.full((1, hidden_size), 0.1, dtype=jnp.float32),
        "w2": xavier(k2, hidden_size, hidden_size),
        "b2": jnp.full((1, hidden_size), 0.1, dtype=jnp.float32),
        "w3": xavier(k3, hidden_size, output_size),
        "b3": jnp.full((1, output_size), 0.1, dtype=jnp.float32),
    }


def _ref_forward(state, params, action_scale):
    # Pure-JAX reference with the same bf16 operand quantization / f32 accumulation.
    bf = jnp.bfloat16
    h = jnp.maximum(jnp.dot(state.astype(bf), params["w1"].astype(bf),
                            preferred_element_type=jnp.float32) + params["b1"], 0.0)
    h = jnp.maximum(jnp.dot(h.astype(bf), params["w2"].astype(bf),
                            preferred_element_type=jnp.float32) + params["b2"], 0.0)
    y = jnp.dot(h.astype(bf), params["w3"].astype(bf),
                preferred_element_type=jnp.float32) + params["b3"]
    return jnp.tanh(y) * action_scale


if __name__ == "__main__":
    # DeterministicActor.sample() == forward(), so the kernel covers both.
    B, INPUT_SIZE, OUTPUT_SIZE, HIDDEN = 8, 32, 8, 128

    key = jax.random.PRNGKey(0)
    k_state, k_params = jax.random.split(key)
    state = jax.random.normal(k_state, (B, INPUT_SIZE), dtype=jnp.float32)
    params = init_params(k_params, INPUT_SIZE, OUTPUT_SIZE, HIDDEN)
    prepared = prepare_params(params)   # one-time weight prep (bf16 cast)

    action = deterministic_actor_forward(state, prepared, action_scale=1.0)
    jax.block_until_ready(action)

    ref = _ref_forward(state, params, 1.0)
    assert action.shape == (B, OUTPUT_SIZE)
    assert jnp.allclose(action, ref, atol=1e-3, rtol=1e-3), \
        f"max abs err = {jnp.max(jnp.abs(action - ref))}"

    print("KERNEL_OK")
</pallas_src>

<mosaic_0001>
module attributes {stable_mosaic.version = 11 : i64} {
  func.func @_actor_kernel(%arg0: i32, %arg1: memref<1x1xf32, #tpu.memory_space<smem>>, %arg2: memref<16x32xf32, #tpu.memory_space<vmem>>, %arg3: memref<32x128xbf16, #tpu.memory_space<vmem>>, %arg4: memref<1x128xf32, #tpu.memory_space<vmem>>, %arg5: memref<128x128xbf16, #tpu.memory_space<vmem>>, %arg6: memref<1x128xf32, #tpu.memory_space<vmem>>, %arg7: memref<128x8xbf16, #tpu.memory_space<vmem>>, %arg8: memref<1x8xf32, #tpu.memory_space<vmem>>, %arg9: memref<16x8xf32, #tpu.memory_space<vmem>>) attributes {dimension_semantics = [#tpu.dimension_semantics<parallel>], iteration_bounds = array<i64: 1>, scalar_prefetch = 0 : i64, scratch_operands = 0 : i64, tpu.core_type = #tpu.core_type<tc>, window_params = [{transform_indices = @transform_0, window_bounds = array<i64: 1, 1>}, {transform_indices = @transform_1, window_bounds = array<i64: 16, 32>}, {pipeline_mode = #tpu.pipeline_mode<synchronous>, transform_indices = @transform_2, window_bounds = array<i64: 32, 128>}, {pipeline_mode = #tpu.pipeline_mode<synchronous>, transform_indices = @transform_3, window_bounds = array<i64: 1, 128>}, {pipeline_mode = #tpu.pipeline_mode<synchronous>, transform_indices = @transform_4, window_bounds = array<i64: 128, 128>}, {pipeline_mode = #tpu.pipeline_mode<synchronous>, transform_indices = @transform_5, window_bounds = array<i64: 1, 128>}, {pipeline_mode = #tpu.pipeline_mode<synchronous>, transform_indices = @transform_6, window_bounds = array<i64: 128, 8>}, {pipeline_mode = #tpu.pipeline_mode<synchronous>, transform_indices = @transform_7, window_bounds = array<i64: 1, 8>}, {transform_indices = @transform_8, window_bounds = array<i64: 16, 8>}]} {
    %c0 = arith.constant 0 : index
    %c0_0 = arith.constant 0 : index
    %0 = vector.load %arg2[%c0, %c0_0] : memref<16x32xf32, #tpu.memory_space<vmem>>, vector<16x32xf32>
    %1 = arith.truncf %0 : vector<16x32xf32> to vector<16x32xbf16>
    %c0_1 = arith.constant 0 : index
    %c0_2 = arith.constant 0 : index
    %2 = vector.load %arg3[%c0_1, %c0_2] : memref<32x128xbf16, #tpu.memory_space<vmem>>, vector<32x128xbf16>
    %cst = arith.constant dense<0.000000e+00> : vector<16x128xf32>
    %3 = tpu.matmul %1, %2, %cst {dimension_numbers = #tpu.dot_dimension_numbers<[1], [0], [0], [1], [0, 0, 1, 1], [], []>} : vector<16x32xbf16>, vector<32x128xbf16>, vector<16x128xf32> -> vector<16x128xf32>
    %c0_3 = arith.constant 0 : index
    %c0_4 = arith.constant 0 : index
    %4 = vector.load %arg4[%c0_3, %c0_4] : memref<1x128xf32, #tpu.memory_space<vmem>>, vector<1x128xf32>
    %5 = vector.broadcast %4 : vector<1x128xf32> to vector<16x128xf32>
    %6 = arith.addf %3, %5 : vector<16x128xf32>
    %cst_5 = arith.constant 0.000000e+00 : f32
    %7 = vector.broadcast %cst_5 : f32 to vector<16x128xf32>
    %8 = arith.maximumf %6, %7 : vector<16x128xf32>
    %9 = arith.truncf %8 : vector<16x128xf32> to vector<16x128xbf16>
    %c0_6 = arith.constant 0 : index
    %c0_7 = arith.constant 0 : index
    %10 = vector.load %arg5[%c0_6, %c0_7] : memref<128x128xbf16, #tpu.memory_space<vmem>>, vector<128x128xbf16>
    %cst_8 = arith.constant dense<0.000000e+00> : vector<16x128xf32>
    %11 = tpu.matmul %9, %10, %cst_8 {dimension_numbers = #tpu.dot_dimension_numbers<[1], [0], [0], [1], [0, 0, 1, 1], [], []>} : vector<16x128xbf16>, vector<128x128xbf16>, vector<16x128xf32> -> vector<16x128xf32>
    %c0_9 = arith.constant 0 : index
    %c0_10 = arith.constant 0 : index
    %12 = vector.load %arg6[%c0_9, %c0_10] : memref<1x128xf32, #tpu.memory_space<vmem>>, vector<1x128xf32>
    %13 = vector.broadcast %12 : vector<1x128xf32> to vector<16x128xf32>
    %14 = arith.addf %11, %13 : vector<16x128xf32>
    %cst_11 = arith.constant 0.000000e+00 : f32
    %15 = vector.broadcast %cst_11 : f32 to vector<16x128xf32>
    %16 = arith.maximumf %14, %15 : vector<16x128xf32>
    %17 = arith.truncf %16 : vector<16x128xf32> to vector<16x128xbf16>
    %c0_12 = arith.constant 0 : index
    %c0_13 = arith.constant 0 : index
    %18 = vector.load %arg7[%c0_12, %c0_13] : memref<128x8xbf16, #tpu.memory_space<vmem>>, vector<128x8xbf16>
    %cst_14 = arith.constant dense<0.000000e+00> : vector<16x8xf32>
    %19 = tpu.matmul %17, %18, %cst_14 {dimension_numbers = #tpu.dot_dimension_numbers<[1], [0], [0], [1], [0, 0, 1, 1], [], []>} : vector<16x128xbf16>, vector<128x8xbf16>, vector<16x8xf32> -> vector<16x8xf32>
    %c0_15 = arith.constant 0 : index
    %c0_16 = arith.constant 0 : index
    %20 = vector.load %arg8[%c0_15, %c0_16] : memref<1x8xf32, #tpu.memory_space<vmem>>, vector<1x8xf32>
    %21 = vector.broadcast %20 : vector<1x8xf32> to vector<16x8xf32>
    %22 = arith.addf %19, %21 : vector<16x8xf32>
    %c0_17 = arith.constant 0 : index
    %c0_18 = arith.constant 0 : index
    %23 = memref.load %arg1[%c0_17, %c0_18] : memref<1x1xf32, #tpu.memory_space<smem>>
    %24 = math.tanh %22 : vector<16x8xf32>
    %25 = vector.broadcast %23 : f32 to vector<16x8xf32>
    %26 = arith.mulf %24, %25 : vector<16x8xf32>
    %c0_19 = arith.constant 0 : index
    %c0_20 = arith.constant 0 : index
    %27 = vector.load %arg9[%c0_19, %c0_20] : memref<16x8xf32, #tpu.memory_space<vmem>>, vector<16x8xf32>
    tpu.vector_store %arg9[%c0_19, %c0_20], %26 {strides = array<i32>} : memref<16x8xf32, #tpu.memory_space<vmem>>, vector<16x8xf32>,
    return
  }
  func.func @transform_0(%arg0: i32) -> (i32, i32) {
    %c0_i32 = arith.constant 0 : i32
    %c0_i32_0 = arith.constant 0 : i32
    %c0_i32_1 = arith.constant 0 : i32
    return %c0_i32, %c0_i32_0 : i32, i32
  }
  func.func @transform_1(%arg0: i32) -> (i32, i32) {
    %c0_i32 = arith.constant 0 : i32
    %c0_i32_0 = arith.constant 0 : i32
    return %arg0, %c0_i32 : i32, i32
  }
  func.func @transform_2(%arg0: i32) -> (i32, i32) {
    %c0_i32 = arith.constant 0 : i32
    %c0_i32_0 = arith.constant 0 : i32
    %c0_i32_1 = arith.constant 0 : i32
    return %c0_i32, %c0_i32_0 : i32, i32
  }
  func.func @transform_3(%arg0: i32) -> (i32, i32) {
    %c0_i32 = arith.constant 0 : i32
    %c0_i32_0 = arith.constant 0 : i32
    %c0_i32_1 = arith.constant 0 : i32
    return %c0_i32, %c0_i32_0 : i32, i32
  }
  func.func @transform_4(%arg0: i32) -> (i32, i32) {
    %c0_i32 = arith.constant 0 : i32
    %c0_i32_0 = arith.constant 0 : i32
    %c0_i32_1 = arith.constant 0 : i32
    return %c0_i32, %c0_i32_0 : i32, i32
  }
  func.func @transform_5(%arg0: i32) -> (i32, i32) {
    %c0_i32 = arith.constant 0 : i32
    %c0_i32_0 = arith.constant 0 : i32
    %c0_i32_1 = arith.constant 0 : i32
    return %c0_i32, %c0_i32_0 : i32, i32
  }
  func.func @transform_6(%arg0: i32) -> (i32, i32) {
    %c0_i32 = arith.constant 0 : i32
    %c0_i32_0 = arith.constant 0 : i32
    %c0_i32_1 = arith.constant 0 : i32
    return %c0_i32, %c0_i32_0 : i32, i32
  }
  func.func @transform_7(%arg0: i32) -> (i32, i32) {
    %c0_i32 = arith.constant 0 : i32
    %c0_i32_0 = arith.constant 0 : i32
    %c0_i32_1 = arith.constant 0 : i32
    return %c0_i32, %c0_i32_0 : i32, i32
  }
  func.func @transform_8(%arg0: i32) -> (i32, i32) {
    %c0_i32 = arith.constant 0 : i32
    %c0_i32_0 = arith.constant 0 : i32
    return %arg0, %c0_i32 : i32, i32
  }
}

</mosaic_0001>

<bundles_post_ra>
// kernel: tpu_custom_call.1
= control target key start
LH: loop header
LB: loop body
LE: loop exit
PB: predicated region body
PF: predicated region fallthrough
CT: control target
= control target key end

     0   :  { %14 = vsyncpa [#allocation4], 0  ;;  %s568_s0 = inlined_call_operand.<no memory space> [shape: f32[1,1], index: 0, kind: input, shape index: {}]   ;;  %s569_s1 = inlined_call_operand.hbm [shape: f32[16,32], index: 1, kind: input, shape index: {}]   ;;  %s570_s2 = inlined_call_operand.hbm [shape: bf16[32,128], index: 2, kind: input, shape index: {}]   ;;  %s571_s3 = inlined_call_operand.vmem [shape: f32[1,128], index: 3, kind: input, shape index: {}]   ;;  %s572_s4 = inlined_call_operand.vmem [shape: bf16[128,128], index: 4, kind: input, shape index: {}]   ;;  %s573_s5 = inlined_call_operand.vmem [shape: f32[1,128], index: 5, kind: input, shape index: {}]   ;;  %s574_s6 = inlined_call_operand.vmem [shape: bf16[128,8], index: 6, kind: input, shape index: {}]   ;;  %s575_s7 = inlined_call_operand.vmem [shape: f32[1,8], index: 7, kind: input, shape index: {}]   ;;  %s576_s8 = inlined_call_operand.vmem [shape: f32[16,8], index: 8, kind: output, shape index: {}]  }
   0x1   :  { %s22_s29 = sshll.u32 %s569_s1, 4  ;;  %s23_s29 = int_to_ptr.hbm [resolvable:$true] %s22_s29 }
   0x2   :  { %15 = vsyncpa [#allocation6], 0  ;;  %s445_s30 = smov [#allocation3]   ;;  %s35_s12 = sshll.u32 %s570_s2, 4  ;;  %s36_s12 = int_to_ptr.hbm [resolvable:$true] %s35_s12 }
   0x3   :  { %s24_s9 = sshll.u32 %s445_s30, 4  ;;  %s446_s13 = smov 128   ;;  %s25_s9 = int_to_ptr.vmem [resolvable:$true] %s24_s9 }
   0x4   :  { %s447_s14 = smov 8   ;;  %s448_s15 = smov [#allocation5]  }
   0x5   :  { %30 = dma.hbm_to_vmem [thread:$0]  %s23_s29, 256, %s25_s9, [#allocation4], %s446_s13, %s446_s13, %s447_s14  }
   0x6   :  { %s37_s16 = sshll.u32 %s448_s15, 4  ;;  %s449_s17 = smov 64   ;;  %s38_s16 = int_to_ptr.vmem [resolvable:$true] %s37_s16 }
   0x7   :  { %s450_s18 = smov 4  }
   0x8   :  { %43 = dma.hbm_to_vmem [thread:$0]  %s36_s12, 256, %s38_s16, [#allocation6], %s449_s17, %s449_s17, %s450_s18  }
   0x9   :  { %441 = dma.done.wait [#allocation4], 256  }
   0xa   :  { %442 = vsyncadd [#allocation4], 4294967040 }
   0xb   :  { %443 = dma.done.wait [#allocation6], 256  }
   0xc   :  { %444 = vsyncadd [#allocation6], 4294967040  ;;  %v363_v0 = vld [vmem:[#allocation5 + $0x8] sm:$0xff]  ;;  %v362_v1 = vld [vmem:[#allocation5] sm:$0xff]  ;;  %vm86_vm0 = vcmask 261120   ;;  %v277_v40 = vstv %s568_s0  ;;  %vm280_vm1 = vcmask 64512  }
   0xd   :  { %v371_v2 = vld [vmem:[%s572_s4 + $0x38] sm:$0xff]  ;;  %96 = vmatpush.bf16.msra.mxu0 %v363_v0  ;;  %v63_v3 = vld [vmem:[#allocation3] sm:$0xff]  ;;  %v64_v4 = vld [vmem:[#allocation3 + $0x8] sm:$0xff] }
   0xe   :  { %175 = vmatpush.bf16.msra.mxu1 %v371_v2  ;;  %v370_v5 = vld [vmem:[%s572_s4 + $0x30] sm:$0xff]  ;;  %v65_v6 = vpack.c.bf16 %v64_v4, %v63_v3  ;;  %v369_v7 = vld [vmem:[%s572_s4 + $0x28] sm:$0xff]  ;;  %v368_v8 = vld [vmem:[%s572_s4 + $0x20] sm:$0xff] }
   0xf   :  { %v367_v9 = vld [vmem:[%s572_s4 + $0x18] sm:$0xff]  ;;  %v366_v10 = vld [vmem:[%s572_s4 + $0x10] sm:$0xff]  ;;  %v365_v11 = vld [vmem:[%s572_s4 + $0x8] sm:$0xff] }
  0x10   :  { %v364_v12 = vld [vmem:[%s572_s4] sm:$0xff]  ;;  %v379_v13 = vld [vmem:[%s574_s6 + $0x38] sm:$0xff]  ;;  %v378_v14 = vld [vmem:[%s574_s6 + $0x30] sm:$0xff] }
  0x11   :  { %97 = vmatpush.bf16.msra.mxu0 %v362_v1  ;;  %260 = vmatpush.bf16.msra.mxu2 %v379_v13  ;;  %v377_v15 = vld [vmem:[%s574_s6 + $0x28] sm:$0xff]  ;;  %v376_v16 = vld [vmem:[%s574_s6 + $0x20] sm:$0xff]  ;;  %v375_v25 = vld [vmem:[%s574_s6 + $0x18] sm:$0xff] }
  0x12   :  { %176 = vmatpush.bf16.msra.mxu1 %v370_v5  ;;  %v386_v18 = vld [vmem:[%s571_s3] ss:$0 sm:$0xff]  ;;  %v374_v26 = vld [vmem:[%s574_s6 + $0x10] sm:$0xff]  ;;  %v373_v27 = vld [vmem:[%s574_s6 + $0x8] sm:$0xff] }
  0x13   :  { %v372_v28 = vld [vmem:[%s574_s6] sm:$0xff] }
  0x14   :  { %297 = vmatmul.msk.bf16.vlgmr.msra.gmra.mxu0 %vm86_vm0, %v65_v6  ;;  %v387_v30 = vld [vmem:[%s573_s5] ss:$0 sm:$0xff] }
  0x15   :  { %261 = vmatpush.bf16.msra.mxu2 %v378_v14  ;;  %v388_v37 = vld [vmem:[%s575_s7] ss:$0 sm:$0xff] }
  0x16   :  { %177 = vmatpush.bf16.msra.mxu1 %v369_v7 }
  0x19   :  { %262 = vmatpush.bf16.msra.mxu2 %v377_v15 }
  0x1a   :  { %178 = vmatpush.bf16.msra.mxu1 %v368_v8 }
  0x1d   :  { %263 = vmatpush.bf16.msra.mxu2 %v376_v16 }
  0x1e   :  { %179 = vmatpush.bf16.msra.mxu1 %v367_v9 }
  0x21   :  { %264 = vmatpush.bf16.msra.mxu2 %v375_v25 }
  0x22   :  { %180 = vmatpush.bf16.msra.mxu1 %v366_v10 }
  0x25   :  { %265 = vmatpush.bf16.msra.mxu2 %v374_v26 }
  0x26   :  { %181 = vmatpush.bf16.msra.mxu1 %v365_v11 }
  0x29   :  { %266 = vmatpush.bf16.msra.mxu2 %v373_v27 }
  0x2a   :  { %182 = vmatpush.bf16.msra.mxu1 %v364_v12 }
  0x2d   :  { %267 = vmatpush.bf16.msra.mxu2 %v372_v28 }
  0x91   :  { %v99_v17 = vpop.f32.mrf.mxu0 }
  0x92   :  { %v100_v19 = vadd.f32 %v386_v18, %v99_v17 }
  0x94   :  { %v104_v22 = vmax.f32 %v100_v19, 0.0 }
  0x99   :  { %v101_v20 = vpop.f32.mrf.mxu0 }
  0x9a   :  { %v102_v21 = vadd.f32 %v386_v18, %v101_v20 }
  0x9c   :  { %v105_v23 = vmax.f32 %v102_v21, 0.0 }
  0x9e   :  { %v106_v24 = vpack.c.bf16 %v105_v23, %v104_v22 }
  0xa0   :  { %183 = vmatmul.bf16.vlgmr.msra.gmra.mxu1 %v106_v24 }
 0x11d   :  { %v184_v29 = vpop.f32.mrf.mxu1 }
 0x11e   :  { %v185_v31 = vadd.f32 %v387_v30, %v184_v29 }
 0x120   :  { %v189_v34 = vmax.f32 %v185_v31, 0.0 }
 0x125   :  { %v186_v32 = vpop.f32.mrf.mxu1 }
 0x126   :  { %v187_v33 = vadd.f32 %v387_v30, %v186_v32 }
 0x128   :  { %v190_v35 = vmax.f32 %v187_v33, 0.0 }
 0x12a   :  { %v191_v36 = vpack.c.bf16 %v190_v35, %v189_v34 }
 0x12c   :  { %268 = vmatmul.bf16.vlgmr.msra.gmra.mxu2 %v191_v36 }
 0x1af   :  { %v269_v38 = vpop.f32.mrf.mxu2 }
 0x1b0   :  { %v270_v39 = vadd.f32 %v388_v37, %v269_v38 }
 0x1b2   :  { %389 = vtanh.f32 %v270_v39 }
 0x1b7   :  { %v271_v41 = vpop.f32.mrf.mxu2 }
 0x1b8   :  { %v390_v42 = vpop.eup %389  ;;  %v272_v43 = vadd.f32 %v388_v37, %v271_v41 }
 0x1b9   :  { %v278_v44 = vmul.f32 %v390_v42, %v277_v40 }
 0x1ba   :  { %391 = vtanh.f32 %v272_v43 }
 0x1bb   :  { %281 = vst.msk [vmem:[%s576_s8] sm:$0xff] %vm280_vm1, %v278_v44 }
 0x1c0   :  { %v392_v45 = vpop.eup %391 }
 0x1c1   :  { %v279_v46 = vmul.f32 %v392_v45, %v277_v40 }
 0x1c3   :  { %282 = vst.msk [vmem:[%s576_s8 + $0x8] sm:$0xff] %vm280_vm1, %v279_v46 }
 0x1c4   :  { %287 = vsyncpa [#allocation4], 1 }
 0x1c5   :  { %288 = vsyncpa [#allocation6], 1 }

</bundles_post_ra>
